<compile_context>
chip_gen: v7x
topology: tpu7x:2x2x1
jax: 0.10.0
libtpu: 0.0.40
codegen_flags: <defaults>
</compile_context>

<pallas_src>
import functools

import jax
import jax.numpy as jnp
from jax.scipy.linalg import block_diag
from jax.experimental import pallas as pl
from jax.experimental.pallas import tpu as pltpu

LN_EPS = 1e-5
_LANE = 128


def _rup(a, m):
    return (a + m - 1) // m * m


def _split_embedding_kernel(layer_norm, x_ref, w_ref, p_ref, out_ref):
    """x_ref: (TB, K_pad)  w_ref: (K_pad, NE)  p_ref: (3, NE)  out_ref: (TB, NE)."""
    # Single MXU matmul per batch tile (block-diag weight folds every per-key,
    # per-entity Linear); f32 accumulation regardless of input dtype.
    emb = jnp.dot(x_ref[...], w_ref[...], preferred_element_type=jnp.float32)
    p = p_ref[...]                                   # rows: [bias, gamma, beta], f32
    emb = emb + p[0:1, :]

    if layer_norm:
        # nn.LayerNorm((N, E)) == per-sample LN over the flattened N*E axis.
        # var = E[x^2] - E[x]^2: one VPU pass + two XLU reductions, not two passes.
        mean = jnp.mean(emb, axis=-1, keepdims=True)
        mean_sq = jnp.mean(emb * emb, axis=-1, keepdims=True)
        var = mean_sq - mean * mean
        inv = jax.lax.rsqrt(var + LN_EPS)
        emb = (emb - mean) * inv * p[1:2, :] + p[2:3, :]

    out_ref[...] = emb.astype(out_ref.dtype)


def pack_split_embedding_params(ws, bs, gamma=None, beta=None, *, entity_counts,
                                compute_dtype=jnp.bfloat16):
    """Fold the per-key Linear weights into one block-diagonal (K_pad, N*E) matrix
    and pack bias/gamma/beta into a (3, N*E) f32 array.

    Call ONCE when the module's weights change; pass the result to
    split_embedding_forward() on every forward (keeps kron/block_diag/stack out
    of the per-step XLA graph).

    ws: list of [D_k, E] (pre-transposed); bs: list of [1, E] or [E];
    gamma/beta: [num_entities, E] or None; entity_counts: list of N_k.
    Returns (w_blk, params, layer_norm).
    """
    E = ws[0].shape[1]
    ns = list(entity_counts)
    N = sum(ns)
    NE = N * E
    D_tot = sum(n * w.shape[0] for n, w in zip(ns, ws))
    K_pad = _rup(D_tot, _LANE)

    # Per-key kron(I_Nk, W_k) (entity-major), block-diag over keys -> (D_tot, NE).
    # Zero blocks contribute exact zeros, so the math matches the per-key Linears.
    w_blk = block_diag(*[
        jnp.kron(jnp.eye(n, dtype=jnp.float32), w.astype(jnp.float32))
        for w, n in zip(ws, ns)])
    # Zero-pad the contraction dim up to a lane multiple (exact zeros -> no-op math,
    # but lane-aligned unmasked loads and a single MXU K tile).
    w_blk = jnp.pad(w_blk, ((0, K_pad - D_tot), (0, 0))).astype(compute_dtype)

    bias_flat = jnp.concatenate(
        [jnp.tile(b.reshape(E).astype(jnp.float32), n) for b, n in zip(bs, ns)])
    layer_norm = gamma is not None
    if layer_norm:
        g_flat = gamma.reshape(NE).astype(jnp.float32)
        be_flat = (jnp.zeros((NE,), jnp.float32) if beta is None
                   else beta.reshape(NE).astype(jnp.float32))
    else:
        g_flat = jnp.ones((NE,), jnp.float32)
        be_flat = jnp.zeros((NE,), jnp.float32)
    params = jnp.stack([bias_flat, g_flat, be_flat], axis=0)        # (3, NE) f32
    return w_blk, params, layer_norm


def split_embedding_forward(xs, w_blk, params, *, layer_norm, block_b=2048,
                            out_dtype=jnp.bfloat16, min_grid_steps=4):
    """xs: list of [B, N_k, D_k]; w_blk/params from pack_split_embedding_params.
    Returns [B, num_entities, embed_dim] in out_dtype."""
    B = xs[0].shape[0]
    K_pad, NE = w_blk.shape
    compute_dtype = w_blk.dtype
    N = sum(x.shape[1] for x in xs)
    E = NE // N
    D_tot = sum(x.shape[1] * x.shape[2] for x in xs)

    # Flatten + concat per-key inputs (entity-major) with the compute-dtype cast
    # folded in (half-width packing pass when compute_dtype is bf16), then
    # zero-pad the contraction dim to K_pad.
    x_flat = jnp.concatenate(
        [x.reshape(B, x.shape[1] * x.shape[2]).astype(compute_dtype) for x in xs],
        axis=-1)
    if K_pad != D_tot:
        x_flat = jnp.pad(x_flat, ((0, 0), (0, K_pad - D_tot)))

    # Batch tiling: big tiles to amortize the ~0.35 us per-grid-step overhead,
    # but keep >= min_grid_steps steps when B allows so the "parallel" axis can
    # shard across both v7x TensorCores and the pipeline stays fed.
    tb = _rup(min(block_b, max(B, 8)), 8)
    if B > min_grid_steps * 8:
        tb = min(tb, _rup(pl.cdiv(B, min_grid_steps), 8))
    tb = max(tb, 8)
    B_pad = _rup(B, tb)
    if B_pad != B:
        x_flat = jnp.pad(x_flat, ((0, B_pad - B), (0, 0)))

    kernel = functools.partial(_split_embedding_kernel, layer_norm)
    out_flat = pl.pallas_call(
        kernel,
        out_shape=jax.ShapeDtypeStruct((B_pad, NE), out_dtype),
        grid=(B_pad // tb,),
        in_specs=[
            pl.BlockSpec((tb, K_pad), lambda i: (i, 0)),   # batch tile of packed inputs
            pl.BlockSpec((K_pad, NE), lambda i: (0, 0)),   # resident block-diag weight
            pl.BlockSpec((3, NE), lambda i: (0, 0)),       # resident bias/gamma/beta
        ],
        out_specs=pl.BlockSpec((tb, NE), lambda i: (i, 0)),  # lane-dense (NE>=128) output
        compiler_params=pltpu.CompilerParams(
            dimension_semantics=("parallel",),
            vmem_limit_bytes=32 * 1024 * 1024),
    )(x_flat, w_blk, params)

    return out_flat[:B].reshape(B, N, E)


def split_embedding(xs, ws, bs, gamma=None, beta=None, *,
                    compute_dtype=jnp.bfloat16, out_dtype=jnp.bfloat16,
                    block_b=2048):
    """Convenience wrapper: pack + forward in one call (tests / one-off use).
    In a training/inference loop, call pack_split_embedding_params once and
    reuse its outputs with split_embedding_forward."""
    ns = [x.shape[1] for x in xs]
    w_blk, params, layer_norm = pack_split_embedding_params(
        ws, bs, gamma, beta, entity_counts=ns, compute_dtype=compute_dtype)
    return split_embedding_forward(xs, w_blk, params, layer_norm=layer_norm,
                                   block_b=block_b, out_dtype=out_dtype)


# ----------------------------- reference & tests -----------------------------

def _reference(xs, ws, bs, gamma, beta):
    embs = [x @ w + b for x, w, b in zip(xs, ws, bs)]
    emb = jnp.concatenate(embs, axis=-2)
    mean = jnp.mean(emb, axis=(-2, -1), keepdims=True)
    var = jnp.mean((emb - mean) ** 2, axis=(-2, -1), keepdims=True)
    return (emb - mean) / jnp.sqrt(var + LN_EPS) * gamma + beta


def _make_inputs(key, B, embed_dim, key_shapes):
    xs, ws, bs = [], [], []
    for _, n_k, d_k in key_shapes:
        key, kx, kw, kb = jax.random.split(key, 4)
        xs.append(jax.random.normal(kx, (B, n_k, d_k), dtype=jnp.float32))
        ws.append(jax.random.normal(kw, (d_k, embed_dim), dtype=jnp.float32) * 0.1)
        bs.append(jax.random.normal(kb, (1, embed_dim), dtype=jnp.float32) * 0.1)
    num_entities = sum(n for _, n, _ in key_shapes)
    key, kg, kbeta = jax.random.split(key, 3)
    gamma = 1.0 + 0.1 * jax.random.normal(kg, (num_entities, embed_dim), dtype=jnp.float32)
    beta = 0.1 * jax.random.normal(kbeta, (num_entities, embed_dim), dtype=jnp.float32)
    return key, xs, ws, bs, gamma, beta, num_entities


if __name__ == "__main__":
    # Synthetic "input_spec": 3 entity groups with different feature sizes.
    #   self:      (B, 1,  9)
    #   others:    (B, 4, 13)
    #   obstacles: (B, 3,  6)
    # embed_dim = 32, num_entities = 8 -> flattened output width 256, layer_norm = True.
    embed_dim = 32
    key_shapes = [("self", 1, 9), ("others", 4, 13), ("obstacles", 3, 6)]
    key = jax.random.PRNGKey(0)

    # Test 1: small batch (B=2), default bf16 compute/IO path.
    key, xs, ws, bs, gamma, beta, num_entities = _make_inputs(key, 2, embed_dim, key_shapes)
    out = jax.block_until_ready(split_embedding(xs, ws, bs, gamma, beta))
    ref = _reference(xs, ws, bs, gamma, beta)
    assert out.shape == (2, num_entities, embed_dim), out.shape
    assert out.dtype == jnp.bfloat16, out.dtype
    err = float(jnp.max(jnp.abs(out.astype(jnp.float32) - ref)))
    assert jnp.allclose(out.astype(jnp.float32), ref, atol=3e-2, rtol=3e-2), err

    # Test 2: f32 compute/IO path (tight tolerance), B not divisible by the tile
    # (exercises padding + multi-step grid + packed-params reuse).
    key, xs, ws, bs, gamma, beta, num_entities = _make_inputs(key, 37, embed_dim, key_shapes)
    ns = [x.shape[1] for x in xs]
    w_blk, params, layer_norm = pack_split_embedding_params(
        ws, bs, gamma, beta, entity_counts=ns, compute_dtype=jnp.float32)
    out = jax.block_until_ready(
        split_embedding_forward(xs, w_blk, params, layer_norm=layer_norm,
                                block_b=16, out_dtype=jnp.float32))
    ref = _reference(xs, ws, bs, gamma, beta)
    assert out.shape == (37, num_entities, embed_dim), out.shape
    err = float(jnp.max(jnp.abs(out - ref)))
    assert jnp.allclose(out, ref, atol=2e-4, rtol=2e-4), err

    # Test 3: bf16 path on the same data (checks padding path with bf16 too).
    out_bf = jax.block_until_ready(split_embedding(xs, ws, bs, gamma, beta, block_b=16))
    err = float(jnp.max(jnp.abs(out_bf.astype(jnp.float32) - ref)))
    assert jnp.allclose(out_bf.astype(jnp.float32), ref, atol=3e-2, rtol=3e-2), err

    # Test 4: no layer_norm path (module with layer_norm=False).
    out_nl = jax.block_until_ready(
        split_embedding(xs, ws, bs, compute_dtype=jnp.float32, out_dtype=jnp.float32))
    ref_nl = jnp.concatenate([x @ w + b for x, w, b in zip(xs, ws, bs)], axis=-2)
    err = float(jnp.max(jnp.abs(out_nl - ref_nl)))
    assert jnp.allclose(out_nl, ref_nl, atol=2e-4, rtol=2e-4), err

    print("KERNEL_OK")
</pallas_src>

<mosaic_0001>
module attributes {stable_mosaic.version = 11 : i64} {
  func.func @_split_embedding_kernel(%arg0: i32, %arg1: memref<8x128xbf16, #tpu.memory_space<vmem>>, %arg2: memref<128x256xbf16, #tpu.memory_space<vmem>>, %arg3: memref<3x256xf32, #tpu.memory_space<vmem>>, %arg4: memref<8x256xbf16, #tpu.memory_space<vmem>>) attributes {dimension_semantics = [#tpu.dimension_semantics<parallel>], iteration_bounds = array<i64: 1>, scalar_prefetch = 0 : i64, scratch_operands = 0 : i64, tpu.core_type = #tpu.core_type<tc>, window_params = [{transform_indices = @transform_0, window_bounds = array<i64: 8, 128>}, {pipeline_mode = #tpu.pipeline_mode<synchronous>, transform_indices = @transform_1, window_bounds = array<i64: 128, 256>}, {pipeline_mode = #tpu.pipeline_mode<synchronous>, transform_indices = @transform_2, window_bounds = array<i64: 3, 256>}, {transform_indices = @transform_3, window_bounds = array<i64: 8, 256>}]} {
    %c0 = arith.constant 0 : index
    %c0_0 = arith.constant 0 : index
    %0 = vector.load %arg1[%c0, %c0_0] : memref<8x128xbf16, #tpu.memory_space<vmem>>, vector<8x128xbf16>
    %c0_1 = arith.constant 0 : index
    %c0_2 = arith.constant 0 : index
    %1 = vector.load %arg2[%c0_1, %c0_2] : memref<128x256xbf16, #tpu.memory_space<vmem>>, vector<128x256xbf16>
    %cst = arith.constant dense<0.000000e+00> : vector<8x256xf32>
    %2 = tpu.matmul %0, %1, %cst {dimension_numbers = #tpu.dot_dimension_numbers<[1], [0], [0], [1], [0, 0, 1, 1], [], []>} : vector<8x128xbf16>, vector<128x256xbf16>, vector<8x256xf32> -> vector<8x256xf32>
    %c0_3 = arith.constant 0 : index
    %c0_4 = arith.constant 0 : index
    %3 = vector.load %arg3[%c0_3, %c0_4] : memref<3x256xf32, #tpu.memory_space<vmem>>, vector<3x256xf32>
    %4 = vector.extract_strided_slice %3 {offsets = [0, 0], sizes = [1, 256], strides = [1, 1]} : vector<3x256xf32> to vector<1x256xf32>
    %5 = vector.broadcast %4 : vector<1x256xf32> to vector<8x256xf32>
    %6 = arith.addf %2, %5 : vector<8x256xf32>
    %cst_5 = arith.constant dense<0.000000e+00> : vector<8xf32>
    %7 = vector.multi_reduction <add>, %6, %cst_5 [1] : vector<8x256xf32> to vector<8xf32>
    %8 = vector.shape_cast %7 : vector<8xf32> to vector<8x1xf32>
    %cst_6 = arith.constant 2.560000e+02 : f32
    %9 = vector.broadcast %cst_6 : f32 to vector<8x1xf32>
    %10 = arith.divf %8, %9 : vector<8x1xf32>
    %11 = arith.mulf %6, %6 : vector<8x256xf32>
    %cst_7 = arith.constant dense<0.000000e+00> : vector<8xf32>
    %12 = vector.multi_reduction <add>, %11, %cst_7 [1] : vector<8x256xf32> to vector<8xf32>
    %13 = vector.shape_cast %12 : vector<8xf32> to vector<8x1xf32>
    %cst_8 = arith.constant 2.560000e+02 : f32
    %14 = vector.broadcast %cst_8 : f32 to vector<8x1xf32>
    %15 = arith.divf %13, %14 : vector<8x1xf32>
    %16 = arith.mulf %10, %10 : vector<8x1xf32>
    %17 = arith.subf %15, %16 : vector<8x1xf32>
    %cst_9 = arith.constant 9.99999974E-6 : f32
    %18 = vector.broadcast %cst_9 : f32 to vector<8x1xf32>
    %19 = arith.addf %17, %18 : vector<8x1xf32>
    %20 = math.rsqrt %19 : vector<8x1xf32>
    %21 = vector.broadcast %10 : vector<8x1xf32> to vector<8x256xf32>
    %22 = arith.subf %6, %21 : vector<8x256xf32>
    %23 = vector.broadcast %20 : vector<8x1xf32> to vector<8x256xf32>
    %24 = arith.mulf %22, %23 : vector<8x256xf32>
    %25 = vector.extract_strided_slice %3 {offsets = [1, 0], sizes = [1, 256], strides = [1, 1]} : vector<3x256xf32> to vector<1x256xf32>
    %26 = vector.broadcast %25 : vector<1x256xf32> to vector<8x256xf32>
    %27 = arith.mulf %24, %26 : vector<8x256xf32>
    %28 = vector.extract_strided_slice %3 {offsets = [2, 0], sizes = [1, 256], strides = [1, 1]} : vector<3x256xf32> to vector<1x256xf32>
    %29 = vector.broadcast %28 : vector<1x256xf32> to vector<8x256xf32>
    %30 = arith.addf %27, %29 : vector<8x256xf32>
    %31 = arith.truncf %30 : vector<8x256xf32> to vector<8x256xbf16>
    %c0_10 = arith.constant 0 : index
    %c0_11 = arith.constant 0 : index
    %32 = vector.load %arg4[%c0_10, %c0_11] : memref<8x256xbf16, #tpu.memory_space<vmem>>, vector<8x256xbf16>
    tpu.vector_store %arg4[%c0_10, %c0_11], %31 {strides = array<i32>} : memref<8x256xbf16, #tpu.memory_space<vmem>>, vector<8x256xbf16>,
    return
  }
  func.func @transform_0(%arg0: i32) -> (i32, i32) {
    %c0_i32 = arith.constant 0 : i32
    %c0_i32_0 = arith.constant 0 : i32
    return %arg0, %c0_i32 : i32, i32
  }
  func.func @transform_1(%arg0: i32) -> (i32, i32) {
    %c0_i32 = arith.constant 0 : i32
    %c0_i32_0 = arith.constant 0 : i32
    %c0_i32_1 = arith.constant 0 : i32
    return %c0_i32, %c0_i32_0 : i32, i32
  }
  func.func @transform_2(%arg0: i32) -> (i32, i32) {
    %c0_i32 = arith.constant 0 : i32
    %c0_i32_0 = arith.constant 0 : i32
    %c0_i32_1 = arith.constant 0 : i32
    return %c0_i32, %c0_i32_0 : i32, i32
  }
  func.func @transform_3(%arg0: i32) -> (i32, i32) {
    %c0_i32 = arith.constant 0 : i32
    %c0_i32_0 = arith.constant 0 : i32
    return %arg0, %c0_i32 : i32, i32
  }
}

</mosaic_0001>

<bundles_post_ra>
// kernel: tpu_custom_call.1
= control target key start
LH: loop header
LB: loop body
LE: loop exit
PB: predicated region body
PF: predicated region fallthrough
CT: control target
= control target key end

     0   :  { %8 = vsyncpa [#allocation3], 0  ;;  %s515_s0 = inlined_call_operand.hbm [shape: bf16[8,128], index: 0, kind: input, shape index: {}]   ;;  %s516_s1 = inlined_call_operand.hbm [shape: bf16[128,256], index: 1, kind: input, shape index: {}]   ;;  %s517_s2 = inlined_call_operand.hbm [shape: f32[3,256], index: 2, kind: input, shape index: {}]   ;;  %s518_s3 = inlined_call_operand.hbm [shape: bf16[8,256], index: 3, kind: output, shape index: {}]  }
   0x1   :  { %9 = vsyncpa [#allocation6], 0 }
   0x2   :  { %10 = vsyncpa [#allocation4], 0  ;;  %s440_s12 = smov [#allocation5]   ;;  %s346_s16 = scalar_lea.hbm %s516_s1, 2048 }
   0x3   :  { %s26_s13 = sshll.u32 %s440_s12, 4  ;;  %p347_p0 = scmp.ne.s32.totalorder %s516_s1, %s346_s16  ;;  %s27_s13 = int_to_ptr.vmem [resolvable:$true] %s26_s13 }
   0x4   :  { %p350_p1 = scmp.lt.u32.totalorder %s346_s16, %s516_s1 }
   0x6   :  { %p352_p2 = pnand %p350_p1, %p347_p0 }
   0x8   :  { %355 = shalt.err (!%p352_p2)
}
   0x9   :  { %s356_s21 = scalar_lea.vmem %s27_s13, 2048  ;;  %p361_p4 = scmp.lt.s32.totalorder %s27_s13, %s27_s13 }
   0xa   :  { %p357_p3 = scmp.ne.s32.totalorder %s27_s13, %s356_s21  ;;  %p362_p5 = scmp.lt.s32.totalorder %s356_s21, %s356_s21 }
   0xc   :  { %p363_p6 = por %p362_p5, %p361_p4 }
   0xe   :  { %p364_p7 = pnand %p363_p6, %p357_p3 }
  0x10   :  { %367 = shalt.err (!%p364_p7)
}
  0x11   :  { %s441_s22 = smov 128   ;;  %s442_s23 = smov 8  }
  0x12   :  { %32 = dma.hbm_to_vmem [thread:$0]  %s516_s1, 2048, %s27_s13, [#allocation6], %s441_s22, %s441_s22, %s442_s23  }
  0x13   :  { %s443_s26 = smov [#allocation2]   ;;  %s444_s28 = smov [#allocation7]  }
  0x14   :  { %s17_s27 = sshll.u32 %s443_s26, 4  ;;  %s39_s29 = sshll.u32 %s444_s28, 4  ;;  %s18_s27 = int_to_ptr.vmem [resolvable:$true] %s17_s27  ;;  %s40_s29 = int_to_ptr.vmem [resolvable:$true] %s39_s29 }
  0x15   :  { %s368_s5 = scalar_lea.hbm %s515_s0, 64 }
  0x16   :  { %p369_p8 = scmp.ne.s32.totalorder %s515_s0, %s368_s5  ;;  %p372_p9 = scmp.lt.u32.totalorder %s368_s5, %s515_s0 }
  0x18   :  { %p374_p10 = pnand %p372_p9, %p369_p8 }
  0x1a   :  { %377 = shalt.err (!%p374_p10)
}
  0x1b   :  { %s378_s1 = scalar_lea.vmem %s18_s27, 64  ;;  %p383_p12 = scmp.lt.s32.totalorder %s18_s27, %s18_s27 }
  0x1c   :  { %p379_p11 = scmp.ne.s32.totalorder %s18_s27, %s378_s1  ;;  %p384_p13 = scmp.lt.s32.totalorder %s378_s1, %s378_s1 }
  0x1e   :  { %p385_p0 = por %p384_p13, %p383_p12 }
  0x20   :  { %p386_p1 = pnand %p385_p0, %p379_p11 }
  0x22   :  { %389 = shalt.err (!%p386_p1)
}
  0x23   :  { %20 = dma.hbm_to_vmem [thread:$0]  %s515_s0, 64, %s18_s27, [#allocation3]  }
  0x24   :  { %s390_s14 = scalar_lea.hbm %s517_s2, 128 }
  0x25   :  { %p391_p2 = scmp.ne.s32.totalorder %s517_s2, %s390_s14  ;;  %p394_p3 = scmp.lt.u32.totalorder %s390_s14, %s517_s2 }
  0x27   :  { %p396_p4 = pnand %p394_p3, %p391_p2 }
  0x29   :  { %399 = shalt.err (!%p396_p4)
}
  0x2a   :  { %s400_s19 = scalar_lea.vmem %s40_s29, 128  ;;  %p405_p6 = scmp.lt.s32.totalorder %s40_s29, %s40_s29 }
  0x2b   :  { %p401_p5 = scmp.ne.s32.totalorder %s40_s29, %s400_s19  ;;  %p406_p7 = scmp.lt.s32.totalorder %s400_s19, %s400_s19 }
  0x2d   :  { %p407_p8 = por %p406_p7, %p405_p6 }
  0x2f   :  { %p408_p9 = pnand %p407_p8, %p401_p5 }
  0x31   :  { %411 = shalt.err (!%p408_p9)
}
  0x32   :  { %42 = dma.hbm_to_vmem [thread:$0]  %s517_s2, 128, %s40_s29, [#allocation6]  }
  0x33   :  { %434 = dma.done.wait [#allocation3], 64  }
  0x34   :  { %435 = vsyncadd [#allocation3], 4294967232 }
  0x35   :  { %436 = dma.done.wait [#allocation6], 2176  }
  0x36   :  { %437 = vsyncadd [#allocation6], 4294965120  ;;  %v445_v0 = vmov 0   ;;  %v320_v1 = vld [vmem:[#allocation5 + $0x4] ss:$8 sps:$4 sm:$0xff]   ;;  %v72_v18 = vlaneseq  ;;  %s446_s2 = smov [#allocation8]  }
  0x37   :  { %202 = vmatprep.mubr.bf16.mxu0 %v445_v0  ;;  %v322_v2 = vld [vmem:[#allocation5] ss:$8 sps:$4 sm:$0xff]   ;;  %170 = vmatprep.subr.bf16.mxu0 %v320_v1  ;;  %v323_v3 = vld [vmem:[#allocation5 + $0x14] ss:$8 sps:$4 sm:$0xff]   ;;  %v325_v4 = vld [vmem:[#allocation5 + $0x10] ss:$8 sps:$4 sm:$0xff]  }
  0x38   :  { %171 = vmatpush1.bf16.msra.mxu0 %v322_v2  ;;  %v326_v5 = vld [vmem:[#allocation5 + $0x24] ss:$8 sps:$4 sm:$0xff]   ;;  %v328_v6 = vld [vmem:[#allocation5 + $0x20] ss:$8 sps:$4 sm:$0xff]   ;;  %v329_v7 = vld [vmem:[#allocation5 + $0x34] ss:$8 sps:$4 sm:$0xff]  }
  0x39   :  { %172 = vmatprep.subr.bf16.mxu0 %v323_v3  ;;  %v331_v8 = vld [vmem:[#allocation5 + $0x30] ss:$8 sps:$4 sm:$0xff]   ;;  %v332_v9 = vld [vmem:[#allocation5 + $0x44] ss:$8 sps:$4 sm:$0xff]   ;;  %v334_v10 = vld [vmem:[#allocation5 + $0x40] ss:$8 sps:$4 sm:$0xff]  }
  0x3a   :  { %v335_v11 = vld [vmem:[#allocation5 + $0x54] ss:$8 sps:$4 sm:$0xff]   ;;  %v337_v12 = vld [vmem:[#allocation5 + $0x50] ss:$8 sps:$4 sm:$0xff]   ;;  %v338_v13 = vld [vmem:[#allocation5 + $0x64] ss:$8 sps:$4 sm:$0xff]  }
  0x3b   :  { %v340_v14 = vld [vmem:[#allocation5 + $0x60] ss:$8 sps:$4 sm:$0xff]   ;;  %v341_v15 = vld [vmem:[#allocation5 + $0x74] ss:$8 sps:$4 sm:$0xff]   ;;  %v343_v16 = vld [vmem:[#allocation5 + $0x70] ss:$8 sps:$4 sm:$0xff]  }
  0x3c   :  { %173 = vmatpush1.bf16.msra.mxu0 %v325_v4  ;;  %v53_v17 = vld [vmem:[#allocation2] sm:$0xf]  ;;  %v73_v19 = vshrl.u32 %v72_v18, 7  ;;  %v70_v21 = vld [vmem:[#allocation7] sm:$0x77]  ;;  %s285_s21 = sshll.u32 %s446_s2, 4  ;;  %s286_s21 = int_to_ptr.vmem [resolvable:$true] %s285_s21 }
  0x3d   :  { %174 = vmatprep.subr.bf16.mxu0 %v326_v5  ;;  %s412_s22 = scalar_lea.vmem %s286_s21, 128  ;;  %p417_p11 = scmp.lt.s32.totalorder %s286_s21, %s286_s21 }
  0x3e   :  { %v74_v20 = vsub.s32 0, %v73_v19  ;;  %v78_v22 = vsub.s32 4, %v73_v19  ;;  %v232_v44 = vsub.s32 1, %v73_v19  ;;  %v236_v45 = vsub.s32 5, %v73_v19  ;;  %p413_p10 = scmp.ne.s32.totalorder %s286_s21, %s412_s22  ;;  %p418_p12 = scmp.lt.s32.totalorder %s412_s22, %s412_s22 }
  0x3f   :  { %v252_v46 = vsub.s32 2, %v73_v19  ;;  %v256_v47 = vsub.s32 6, %v73_v19 }
  0x40   :  { %175 = vmatpush1.bf16.msra.mxu0 %v328_v6  ;;  %v75_v23 = vrot.slane %v70_v21, %v74_v20  ;;  %v79_v24 = vrot.slane %v70_v21, %v78_v22  ;;  %v233_v48 = vrot.slane %v70_v21, %v232_v44  ;;  %v237_v49 = vrot.slane %v70_v21, %v236_v45  ;;  %p419_p13 = por %p418_p12, %p417_p11 }
  0x41   :  { %176 = vmatprep.subr.bf16.mxu0 %v329_v7  ;;  %v253_v50 = vrot.slane %v70_v21, %v252_v46  ;;  %v257_v51 = vrot.slane %v70_v21, %v256_v47 }
  0x42   :  { %v85_v25 = vrot.slane %v75_v23, %v74_v20  ;;  %v89_v26 = vrot.slane %v79_v24, %v74_v20  ;;  %v243_v54 = vrot.slane %v233_v48, %v232_v44  ;;  %v247_v55 = vrot.slane %v237_v49, %v232_v44  ;;  %p420_p0 = pnand %p419_p13, %p413_p10 }
  0x43   :  { %v263_v59 = vrot.slane %v253_v50, %v252_v46  ;;  %v267_v60 = vrot.slane %v257_v51, %v252_v46 }
  0x44   :  { %177 = vmatpush1.bf16.msra.mxu0 %v331_v8 }
  0x45   :  { %178 = vmatprep.subr.bf16.mxu0 %v332_v9 }
  0x48   :  { %179 = vmatpush1.bf16.msra.mxu0 %v334_v10 }
  0x49   :  { %180 = vmatprep.subr.bf16.mxu0 %v335_v11 }
  0x4c   :  { %181 = vmatpush1.bf16.msra.mxu0 %v337_v12 }
  0x4d   :  { %182 = vmatprep.subr.bf16.mxu0 %v338_v13 }
  0x50   :  { %183 = vmatpush1.bf16.msra.mxu0 %v340_v14 }
  0x51   :  { %184 = vmatprep.subr.bf16.mxu0 %v341_v15 }
  0x54   :  { %185 = vmatpush1.bf16.msra.mxu0 %v343_v16 }
  0x57   :  { %203 = vmatmul.mubr.bf16.vlgmr.msra.gmra.mrb[0].mxu0 %v53_v17 }
 0x12a   :  { %v204_v27 = vpop.f32.mrb[0].mxu0 }
 0x12b   :  { %v205_v28 = vadd.f32 %v204_v27, %v85_v25  ;;  %v206_v29 = vpop.f32.mrb[1].mxu0 }
 0x12c   :  { %v207_v30 = vadd.f32 %v206_v29, %v89_v26  ;;  %v208_v31 = vpop.f32.mrb[2].mxu0 }
 0x12d   :  { %v209_v32 = vpop.f32.mrb[3].mxu0  ;;  %v216_v34 = vmul.f32 %v205_v28, %v205_v28 }
 0x12e   :  { %v211_v33 = vadd.f32 %v207_v30, %v205_v28  ;;  %v217_v35 = vmul.f32 %v207_v30, %v207_v30 }
 0x130   :  { %212 = vadd.xlane.f32.xlu0 %v211_v33  ;;  %v218_v36 = vadd.f32 %v217_v35, %v216_v34 }
 0x134   :  { %219 = vadd.xlane.f32.xlu0 %v218_v36 }
 0x1bd   :  { %v213_v37 = vpop.xlane.xlu0 %212 }
 0x1be   :  { %v215_v38 = vmul.f32 0.00390625, %v213_v37 }
 0x1c0   :  { %v222_v40 = vmul.f32 %v215_v38, %v215_v38  ;;  %v226_v52 = vsub.f32 %v205_v28, %v215_v38  ;;  %v227_v53 = vsub.f32 %v207_v30, %v215_v38 }
 0x1c1   :  { %v220_v39 = vpop.xlane.xlu0 %219 }
 0x1c2   :  { %v221_v41 = vmul.f32 0.00390625, %v220_v39 }
 0x1c4   :  { %v223_v42 = vsub.f32 %v221_v41, %v222_v40 }
 0x1c6   :  { %v224_v43 = vadd.f32 1e-05, %v223_v42 }
 0x1c8   :  { %344 = vrsqrt.f32 %v224_v43 }
 0x1d2   :  { %v345_v56 = vpop.eup %344 }
 0x1d3   :  { %v228_v57 = vmul.f32 %v345_v56, %v226_v52  ;;  %v229_v58 = vmul.f32 %v345_v56, %v227_v53 }
 0x1d5   :  { %v248_v61 = vmul.f32 %v243_v54, %v228_v57  ;;  %v249_v62 = vmul.f32 %v247_v55, %v229_v58 }
 0x1d7   :  { %v268_v63 = vadd.f32 %v263_v59, %v248_v61  ;;  %v269_v0 = vadd.f32 %v267_v60, %v249_v62 }
 0x1d9   :  { %v312_v1 = vpack.c.bf16 %v269_v0, %v268_v63 }
 0x1db   :  { %278 = vst [vmem:[#allocation8] sm:$0xff] %v312_v1 }
 0x1dc   :  { %423 = shalt.err (!%p420_p0)
}
 0x1dd   :  { %s424_s25 = scalar_lea.hbm %s518_s3, 128 }
 0x1de   :  { %p425_p1 = scmp.ne.s32.totalorder %s518_s3, %s424_s25  ;;  %p428_p2 = scmp.lt.u32.totalorder %s424_s25, %s518_s3 }
 0x1e0   :  { %p430_p3 = pnand %p428_p2, %p425_p1 }
 0x1e2   :  { %433 = shalt.err (!%p430_p3)
}
 0x1e3   :  { %288 = dma.vmem_to_hbm [thread:$0]  %s286_s21, 128, %s518_s3, [#allocation4]  }
 0x1e4   :  { %438 = dma.done.wait [#allocation4], 128  }
 0x1e5   :  { %439 = vsyncadd [#allocation4], 4294967168 }
 0x1e6   :  { %292 = vsyncpa [#allocation3], 1 }
 0x1e7   :  { %293 = vsyncpa [#allocation6], 1 }
 0x1e8   :  { %294 = vsyncpa [#allocation4], 1 }

</bundles_post_ra>
